<compile_context>
chip_gen: v7x
topology: tpu7x:2x2x1
jax: 0.10.0
libtpu: 0.0.40
codegen_flags: <defaults>
</compile_context>

<pallas_src>
import math
import jax
import jax.numpy as jnp
from jax.experimental import pallas as pl
from jax.experimental.pallas import tpu as pltpu

# Small synthetic hyper-parameters (module defaults d_model=300, d_inner=256
# are scaled down per the task instructions).
D_MODEL = 32
D_INNER = 64
N_HEAD  = 4
D_K     = D_MODEL // N_HEAD   # 8
D_V     = D_MODEL // N_HEAD   # 8
LN_EPS  = 1e-6


def _layer_norm(x, gamma, beta):
    mean = jnp.mean(x, axis=-1, keepdims=True)
    var  = jnp.mean((x - mean) ** 2, axis=-1, keepdims=True)
    return (x - mean) * jax.lax.rsqrt(var + LN_EPS) * gamma + beta


def _make_kernel(B, S):
    HDK = N_HEAD * D_K
    HDV = N_HEAD * D_V
    scale = 1.0 / math.sqrt(D_K)

    def kernel(x_ref, wqkv_ref, bqkv_ref, wo_ref, bo_ref, g1_ref, bb1_ref,
               w1_ref, b1_ref, w2_ref, b2_ref, g2_ref, bb2_ref,
               out_ref, attn_ref, q_sc, k_sc, v_sc):
        x = x_ref[...]                                              # (B*S, D)

        # ---- fused Q/K/V projection: one MXU matmul ----
        qkv = jnp.dot(x, wqkv_ref[...],
                      preferred_element_type=jnp.float32) + bqkv_ref[...]

        # ---- split heads once into (H*B, S, Dk) scratch (static slices) ----
        for h in range(N_HEAD):
            q_sc[h * B:(h + 1) * B] = (
                qkv[:, h * D_K:(h + 1) * D_K].reshape(B, S, D_K))
            k_sc[h * B:(h + 1) * B] = (
                qkv[:, HDK + h * D_K:HDK + (h + 1) * D_K].reshape(B, S, D_K))
            v_sc[h * B:(h + 1) * B] = (
                qkv[:, 2 * HDK + h * D_V:2 * HDK + (h + 1) * D_V]
                .reshape(B, S, D_V))

        qh = q_sc[...]                                               # (H*B, S, Dk)
        kh = k_sc[...]
        vh = v_sc[...]

        # ---- scaled dot-product attention, all heads & batches batched ----
        s = jnp.einsum('nqd,nkd->nqk', qh, kh,
                       preferred_element_type=jnp.float32) * scale   # (H*B, S, S)
        # TODO(synk): slf_attn_mask path not implemented (mask=None assumed)
        s = s - jnp.max(s, axis=-1, keepdims=True)
        e = jnp.exp(s)
        # exact normalization (approx reciprocal was not accurate enough for
        # the row-sum check; divide cost is negligible at this size)
        p = e / jnp.sum(e, axis=-1, keepdims=True)

        attn_ref[...] = p          # single stacked store (wrapper re-layouts)

        ctx = jnp.einsum('nqk,nkd->nqd', p, vh,
                         preferred_element_type=jnp.float32)         # (H*B, S, Dv)

        # ---- merge heads back to (B*S, H*Dv), head-major feature layout ----
        ctx_m = jnp.concatenate(
            [ctx[h * B:(h + 1) * B] for h in range(N_HEAD)], axis=-1)  # (B, S, HDV)
        ctx2 = ctx_m.reshape(B * S, HDV)

        o = jnp.dot(ctx2, wo_ref[...],
                    preferred_element_type=jnp.float32) + bo_ref[...]
        # dropout == identity (eval mode)
        y = _layer_norm(o + x, g1_ref[...], bb1_ref[...])

        # ---- position-wise feed-forward ----
        h1 = jnp.maximum(
            jnp.dot(y, w1_ref[...], preferred_element_type=jnp.float32)
            + b1_ref[...], 0.0)
        f = jnp.dot(h1, w2_ref[...], preferred_element_type=jnp.float32) + b2_ref[...]
        out = _layer_norm(f + y, g2_ref[...], bb2_ref[...])
        out_ref[...] = out.astype(out_ref.dtype)

    return kernel


@jax.jit
def encoder_layer(x, params):
    """x: (B, S, D_MODEL) float32. Returns (enc_output (B,S,D), attn (B,H,S,S))."""
    B, S, D = x.shape
    assert D == D_MODEL
    (wq, wk, wv, bq, bk, bv, wo, bo,
     g1, bb1, w1, b1, w2, b2, g2, bb2) = params

    # host-side QKV weight/bias fusion -> single projection matmul in-kernel
    wqkv = jnp.concatenate([wq, wk, wv], axis=1)          # (D, 3*H*Dk)
    bqkv = jnp.concatenate([bq, bk, bv], axis=1)          # (1, 3*H*Dk)
    x2 = x.reshape(B * S, D)                              # flatten batch*seq

    kernel = _make_kernel(B, S)
    out2, attn_hb = pl.pallas_call(
        kernel,
        out_shape=(jax.ShapeDtypeStruct((B * S, D), x.dtype),
                   jax.ShapeDtypeStruct((N_HEAD * B, S, S), jnp.float32)),
        scratch_shapes=[pltpu.VMEM((N_HEAD * B, S, D_K), jnp.float32),
                        pltpu.VMEM((N_HEAD * B, S, D_K), jnp.float32),
                        pltpu.VMEM((N_HEAD * B, S, D_V), jnp.float32)],
    )(x2, wqkv, bqkv, wo, bo, g1, bb1, w1, b1, w2, b2, g2, bb2)

    enc_out = out2.reshape(B, S, D)
    # (H*B, S, S) -> (B, H, S, S): pure layout plumbing outside the kernel
    attn = attn_hb.reshape(N_HEAD, B, S, S).transpose(1, 0, 2, 3)
    return enc_out, attn


def encoder_layer_ref(x, params):
    """Pure-JAX reference (same math, standard layouts)."""
    (wq, wk, wv, bq, bk, bv, wo, bo,
     g1, bb1, w1, b1, w2, b2, g2, bb2) = params
    B, S, D = x.shape
    x2 = x.reshape(B * S, D)
    q = (x2 @ wq + bq).reshape(B, S, N_HEAD, D_K).transpose(0, 2, 1, 3)
    k = (x2 @ wk + bk).reshape(B, S, N_HEAD, D_K).transpose(0, 2, 1, 3)
    v = (x2 @ wv + bv).reshape(B, S, N_HEAD, D_V).transpose(0, 2, 1, 3)
    s = jnp.einsum('bhqd,bhkd->bhqk', q, k) / math.sqrt(D_K)
    p = jax.nn.softmax(s, axis=-1)                                  # (B,H,S,S)
    ctx = jnp.einsum('bhqk,bhkd->bhqd', p, v)
    ctx = ctx.transpose(0, 2, 1, 3).reshape(B * S, N_HEAD * D_V)
    o = ctx @ wo + bo
    y = _layer_norm(o + x2, g1, bb1)
    h1 = jnp.maximum(y @ w1 + b1, 0.0)
    f = h1 @ w2 + b2
    out = _layer_norm(f + y, g2, bb2)
    return out.reshape(B, S, D), p


def init_params(key):
    ks = jax.random.split(key, 12)
    scale = 0.1
    wq = scale * jax.random.normal(ks[0], (D_MODEL, N_HEAD * D_K), jnp.float32)
    wk = scale * jax.random.normal(ks[1], (D_MODEL, N_HEAD * D_K), jnp.float32)
    wv = scale * jax.random.normal(ks[2], (D_MODEL, N_HEAD * D_V), jnp.float32)
    bq = scale * jax.random.normal(ks[3], (1, N_HEAD * D_K), jnp.float32)
    bk = scale * jax.random.normal(ks[4], (1, N_HEAD * D_K), jnp.float32)
    bv = scale * jax.random.normal(ks[5], (1, N_HEAD * D_V), jnp.float32)
    wo = scale * jax.random.normal(ks[6], (N_HEAD * D_V, D_MODEL), jnp.float32)
    bo = scale * jax.random.normal(ks[7], (1, D_MODEL), jnp.float32)
    g1  = jnp.ones((1, D_MODEL), jnp.float32)
    bb1 = jnp.zeros((1, D_MODEL), jnp.float32)
    w1 = scale * jax.random.normal(ks[8], (D_MODEL, D_INNER), jnp.float32)
    b1 = scale * jax.random.normal(ks[9], (1, D_INNER), jnp.float32)
    w2 = scale * jax.random.normal(ks[10], (D_INNER, D_MODEL), jnp.float32)
    b2 = scale * jax.random.normal(ks[11], (1, D_MODEL), jnp.float32)
    g2  = jnp.ones((1, D_MODEL), jnp.float32)
    bb2 = jnp.zeros((1, D_MODEL), jnp.float32)
    return (wq, wk, wv, bq, bk, bv, wo, bo,
            g1, bb1, w1, b1, w2, b2, g2, bb2)


if __name__ == "__main__":
    B, S = 2, 8
    key = jax.random.PRNGKey(0)
    k_x, k_p = jax.random.split(key)
    x = jax.random.normal(k_x, (B, S, D_MODEL), jnp.float32)
    params = init_params(k_p)

    enc_out, attn = encoder_layer(x, params)
    jax.block_until_ready(enc_out)
    jax.block_until_ready(attn)

    assert enc_out.shape == (B, S, D_MODEL)
    assert attn.shape == (B, N_HEAD, S, S)
    assert bool(jnp.all(jnp.isfinite(enc_out)))
    assert bool(jnp.all(jnp.isfinite(attn)))
    # softmax rows sum to 1 (exact division now)
    assert bool(jnp.allclose(jnp.sum(attn, axis=-1), 1.0, atol=1e-3))

    # correctness vs. pure-JAX reference
    ref_out, ref_attn = encoder_layer_ref(x, params)
    assert bool(jnp.allclose(enc_out, ref_out, rtol=2e-2, atol=2e-2))
    assert bool(jnp.allclose(attn, ref_attn, rtol=2e-2, atol=2e-2))
    print("KERNEL_OK")
</pallas_src>

<mosaic_0001>
module attributes {stable_mosaic.version = 11 : i64} {
  func.func @kernel(%arg0: memref<16x32xf32, #tpu.memory_space<vmem>>, %arg1: memref<32x96xf32, #tpu.memory_space<vmem>>, %arg2: memref<1x96xf32, #tpu.memory_space<vmem>>, %arg3: memref<32x32xf32, #tpu.memory_space<vmem>>, %arg4: memref<1x32xf32, #tpu.memory_space<vmem>>, %arg5: memref<1x32xf32, #tpu.memory_space<vmem>>, %arg6: memref<1x32xf32, #tpu.memory_space<vmem>>, %arg7: memref<32x64xf32, #tpu.memory_space<vmem>>, %arg8: memref<1x64xf32, #tpu.memory_space<vmem>>, %arg9: memref<64x32xf32, #tpu.memory_space<vmem>>, %arg10: memref<1x32xf32, #tpu.memory_space<vmem>>, %arg11: memref<1x32xf32, #tpu.memory_space<vmem>>, %arg12: memref<1x32xf32, #tpu.memory_space<vmem>>, %arg13: memref<16x32xf32, #tpu.memory_space<vmem>>, %arg14: memref<8x8x8xf32, #tpu.memory_space<vmem>>, %arg15: memref<8x8x8xf32, #tpu.memory_space<vmem>>, %arg16: memref<8x8x8xf32, #tpu.memory_space<vmem>>, %arg17: memref<8x8x8xf32, #tpu.memory_space<vmem>>) attributes {dimension_semantics = [], scalar_prefetch = 0 : i64, scratch_operands = 3 : i64, tpu.core_type = #tpu.core_type<tc>} {
    %c0 = arith.constant 0 : index
    %c0_0 = arith.constant 0 : index
    %0 = vector.load %arg0[%c0, %c0_0] : memref<16x32xf32, #tpu.memory_space<vmem>>, vector<16x32xf32>
    %c0_1 = arith.constant 0 : index
    %c0_2 = arith.constant 0 : index
    %1 = vector.load %arg1[%c0_1, %c0_2] : memref<32x96xf32, #tpu.memory_space<vmem>>, vector<32x96xf32>
    %cst = arith.constant dense<0.000000e+00> : vector<16x96xf32>
    %2 = tpu.matmul %0, %1, %cst {dimension_numbers = #tpu.dot_dimension_numbers<[1], [0], [0], [1], [0, 0, 1, 1], [], []>} : vector<16x32xf32>, vector<32x96xf32>, vector<16x96xf32> -> vector<16x96xf32>
    %c0_3 = arith.constant 0 : index
    %c0_4 = arith.constant 0 : index
    %3 = vector.load %arg2[%c0_3, %c0_4] : memref<1x96xf32, #tpu.memory_space<vmem>>, vector<1x96xf32>
    %4 = vector.broadcast %3 : vector<1x96xf32> to vector<16x96xf32>
    %5 = arith.addf %2, %4 : vector<16x96xf32>
    %6 = vector.extract_strided_slice %5 {offsets = [0, 0], sizes = [16, 8], strides = [1, 1]} : vector<16x96xf32> to vector<16x8xf32>
    %7 = vector.shape_cast %6 : vector<16x8xf32> to vector<2x8x8xf32>
    %c0_5 = arith.constant 0 : index
    %c0_6 = arith.constant 0 : index
    %c0_7 = arith.constant 0 : index
    %8 = vector.load %arg15[%c0_5, %c0_6, %c0_7] : memref<8x8x8xf32, #tpu.memory_space<vmem>>, vector<2x8x8xf32>
    tpu.vector_store %arg15[%c0_5, %c0_6, %c0_7], %7 {strides = array<i32>} : memref<8x8x8xf32, #tpu.memory_space<vmem>>, vector<2x8x8xf32>,
    %9 = vector.extract_strided_slice %5 {offsets = [0, 32], sizes = [16, 8], strides = [1, 1]} : vector<16x96xf32> to vector<16x8xf32>
    %10 = vector.shape_cast %9 : vector<16x8xf32> to vector<2x8x8xf32>
    %c0_8 = arith.constant 0 : index
    %c0_9 = arith.constant 0 : index
    %c0_10 = arith.constant 0 : index
    %11 = vector.load %arg16[%c0_8, %c0_9, %c0_10] : memref<8x8x8xf32, #tpu.memory_space<vmem>>, vector<2x8x8xf32>
    tpu.vector_store %arg16[%c0_8, %c0_9, %c0_10], %10 {strides = array<i32>} : memref<8x8x8xf32, #tpu.memory_space<vmem>>, vector<2x8x8xf32>,
    %12 = vector.extract_strided_slice %5 {offsets = [0, 64], sizes = [16, 8], strides = [1, 1]} : vector<16x96xf32> to vector<16x8xf32>
    %13 = vector.shape_cast %12 : vector<16x8xf32> to vector<2x8x8xf32>
    %c0_11 = arith.constant 0 : index
    %c0_12 = arith.constant 0 : index
    %c0_13 = arith.constant 0 : index
    %14 = vector.load %arg17[%c0_11, %c0_12, %c0_13] : memref<8x8x8xf32, #tpu.memory_space<vmem>>, vector<2x8x8xf32>
    tpu.vector_store %arg17[%c0_11, %c0_12, %c0_13], %13 {strides = array<i32>} : memref<8x8x8xf32, #tpu.memory_space<vmem>>, vector<2x8x8xf32>,
    %15 = vector.extract_strided_slice %5 {offsets = [0, 8], sizes = [16, 8], strides = [1, 1]} : vector<16x96xf32> to vector<16x8xf32>
    %16 = vector.shape_cast %15 : vector<16x8xf32> to vector<2x8x8xf32>
    %c2 = arith.constant 2 : index
    %c0_14 = arith.constant 0 : index
    %c0_15 = arith.constant 0 : index
    %17 = vector.load %arg15[%c2, %c0_14, %c0_15] : memref<8x8x8xf32, #tpu.memory_space<vmem>>, vector<2x8x8xf32>
    tpu.vector_store %arg15[%c2, %c0_14, %c0_15], %16 {strides = array<i32>} : memref<8x8x8xf32, #tpu.memory_space<vmem>>, vector<2x8x8xf32>,
    %18 = vector.extract_strided_slice %5 {offsets = [0, 40], sizes = [16, 8], strides = [1, 1]} : vector<16x96xf32> to vector<16x8xf32>
    %19 = vector.shape_cast %18 : vector<16x8xf32> to vector<2x8x8xf32>
    %c2_16 = arith.constant 2 : index
    %c0_17 = arith.constant 0 : index
    %c0_18 = arith.constant 0 : index
    %20 = vector.load %arg16[%c2_16, %c0_17, %c0_18] : memref<8x8x8xf32, #tpu.memory_space<vmem>>, vector<2x8x8xf32>
    tpu.vector_store %arg16[%c2_16, %c0_17, %c0_18], %19 {strides = array<i32>} : memref<8x8x8xf32, #tpu.memory_space<vmem>>, vector<2x8x8xf32>,
    %21 = vector.extract_strided_slice %5 {offsets = [0, 72], sizes = [16, 8], strides = [1, 1]} : vector<16x96xf32> to vector<16x8xf32>
    %22 = vector.shape_cast %21 : vector<16x8xf32> to vector<2x8x8xf32>
    %c2_19 = arith.constant 2 : index
    %c0_20 = arith.constant 0 : index
    %c0_21 = arith.constant 0 : index
    %23 = vector.load %arg17[%c2_19, %c0_20, %c0_21] : memref<8x8x8xf32, #tpu.memory_space<vmem>>, vector<2x8x8xf32>
    tpu.vector_store %arg17[%c2_19, %c0_20, %c0_21], %22 {strides = array<i32>} : memref<8x8x8xf32, #tpu.memory_space<vmem>>, vector<2x8x8xf32>,
    %24 = vector.extract_strided_slice %5 {offsets = [0, 16], sizes = [16, 8], strides = [1, 1]} : vector<16x96xf32> to vector<16x8xf32>
    %25 = vector.shape_cast %24 : vector<16x8xf32> to vector<2x8x8xf32>
    %c4 = arith.constant 4 : index
    %c0_22 = arith.constant 0 : index
    %c0_23 = arith.constant 0 : index
    %26 = vector.load %arg15[%c4, %c0_22, %c0_23] : memref<8x8x8xf32, #tpu.memory_space<vmem>>, vector<2x8x8xf32>
    tpu.vector_store %arg15[%c4, %c0_22, %c0_23], %25 {strides = array<i32>} : memref<8x8x8xf32, #tpu.memory_space<vmem>>, vector<2x8x8xf32>,
    %27 = vector.extract_strided_slice %5 {offsets = [0, 48], sizes = [16, 8], strides = [1, 1]} : vector<16x96xf32> to vector<16x8xf32>
    %28 = vector.shape_cast %27 : vector<16x8xf32> to vector<2x8x8xf32>
    %c4_24 = arith.constant 4 : index
    %c0_25 = arith.constant 0 : index
    %c0_26 = arith.constant 0 : index
    %29 = vector.load %arg16[%c4_24, %c0_25, %c0_26] : memref<8x8x8xf32, #tpu.memory_space<vmem>>, vector<2x8x8xf32>
    tpu.vector_store %arg16[%c4_24, %c0_25, %c0_26], %28 {strides = array<i32>} : memref<8x8x8xf32, #tpu.memory_space<vmem>>, vector<2x8x8xf32>,
    %30 = vector.extract_strided_slice %5 {offsets = [0, 80], sizes = [16, 8], strides = [1, 1]} : vector<16x96xf32> to vector<16x8xf32>
    %31 = vector.shape_cast %30 : vector<16x8xf32> to vector<2x8x8xf32>
    %c4_27 = arith.constant 4 : index
    %c0_28 = arith.constant 0 : index
    %c0_29 = arith.constant 0 : index
    %32 = vector.load %arg17[%c4_27, %c0_28, %c0_29] : memref<8x8x8xf32, #tpu.memory_space<vmem>>, vector<2x8x8xf32>
    tpu.vector_store %arg17[%c4_27, %c0_28, %c0_29], %31 {strides = array<i32>} : memref<8x8x8xf32, #tpu.memory_space<vmem>>, vector<2x8x8xf32>,
    %33 = vector.extract_strided_slice %5 {offsets = [0, 24], sizes = [16, 8], strides = [1, 1]} : vector<16x96xf32> to vector<16x8xf32>
    %34 = vector.shape_cast %33 : vector<16x8xf32> to vector<2x8x8xf32>
    %c6 = arith.constant 6 : index
    %c0_30 = arith.constant 0 : index
    %c0_31 = arith.constant 0 : index
    %35 = vector.load %arg15[%c6, %c0_30, %c0_31] : memref<8x8x8xf32, #tpu.memory_space<vmem>>, vector<2x8x8xf32>
    tpu.vector_store %arg15[%c6, %c0_30, %c0_31], %34 {strides = array<i32>} : memref<8x8x8xf32, #tpu.memory_space<vmem>>, vector<2x8x8xf32>,
    %36 = vector.extract_strided_slice %5 {offsets = [0, 56], sizes = [16, 8], strides = [1, 1]} : vector<16x96xf32> to vector<16x8xf32>
    %37 = vector.shape_cast %36 : vector<16x8xf32> to vector<2x8x8xf32>
    %c6_32 = arith.constant 6 : index
    %c0_33 = arith.constant 0 : index
    %c0_34 = arith.constant 0 : index
    %38 = vector.load %arg16[%c6_32, %c0_33, %c0_34] : memref<8x8x8xf32, #tpu.memory_space<vmem>>, vector<2x8x8xf32>
    tpu.vector_store %arg16[%c6_32, %c0_33, %c0_34], %37 {strides = array<i32>} : memref<8x8x8xf32, #tpu.memory_space<vmem>>, vector<2x8x8xf32>,
    %39 = vector.extract_strided_slice %5 {offsets = [0, 88], sizes = [16, 8], strides = [1, 1]} : vector<16x96xf32> to vector<16x8xf32>
    %40 = vector.shape_cast %39 : vector<16x8xf32> to vector<2x8x8xf32>
    %c6_35 = arith.constant 6 : index
    %c0_36 = arith.constant 0 : index
    %c0_37 = arith.constant 0 : index
    %41 = vector.load %arg17[%c6_35, %c0_36, %c0_37] : memref<8x8x8xf32, #tpu.memory_space<vmem>>, vector<2x8x8xf32>
    tpu.vector_store %arg17[%c6_35, %c0_36, %c0_37], %40 {strides = array<i32>} : memref<8x8x8xf32, #tpu.memory_space<vmem>>, vector<2x8x8xf32>,
    %c0_38 = arith.constant 0 : index
    %c0_39 = arith.constant 0 : index
    %c0_40 = arith.constant 0 : index
    %42 = vector.load %arg15[%c0_38, %c0_39, %c0_40] : memref<8x8x8xf32, #tpu.memory_space<vmem>>, vector<8x8x8xf32>
    %c0_41 = arith.constant 0 : index
    %c0_42 = arith.constant 0 : index
    %c0_43 = arith.constant 0 : index
    %43 = vector.load %arg16[%c0_41, %c0_42, %c0_43] : memref<8x8x8xf32, #tpu.memory_space<vmem>>, vector<8x8x8xf32>
    %c0_44 = arith.constant 0 : index
    %c0_45 = arith.constant 0 : index
    %c0_46 = arith.constant 0 : index
    %44 = vector.load %arg17[%c0_44, %c0_45, %c0_46] : memref<8x8x8xf32, #tpu.memory_space<vmem>>, vector<8x8x8xf32>
    "tpu.trace_start"() <{level = 10 : i32, message = "nqd,nkd->nqk"}> : () -> ()
    %cst_47 = arith.constant dense<0.000000e+00> : vector<8x8x8xf32>
    %45 = tpu.matmul %42, %43, %cst_47 {dimension_numbers = #tpu.dot_dimension_numbers<[2], [2], [1], [1], [0, 0, 0, 1, 1, 1], [0], [0]>} : vector<8x8x8xf32>, vector<8x8x8xf32>, vector<8x8x8xf32> -> vector<8x8x8xf32>
    "tpu.trace_stop"() : () -> ()
    %cst_48 = arith.constant 0.353553385 : f32
    %46 = vector.broadcast %cst_48 : f32 to vector<8x8x8xf32>
    %47 = arith.mulf %45, %46 : vector<8x8x8xf32>
    %cst_49 = arith.constant dense<0xFF800000> : vector<8x8xf32>
    %48 = vector.multi_reduction <maximumf>, %47, %cst_49 [2] : vector<8x8x8xf32> to vector<8x8xf32>
    %49 = vector.shape_cast %48 : vector<8x8xf32> to vector<8x8x1xf32>
    %50 = vector.broadcast %49 : vector<8x8x1xf32> to vector<8x8x8xf32>
    %51 = arith.subf %47, %50 : vector<8x8x8xf32>
    %52 = math.exp %51 : vector<8x8x8xf32>
    %cst_50 = arith.constant dense<0.000000e+00> : vector<8x8xf32>
    %53 = vector.multi_reduction <add>, %52, %cst_50 [2] : vector<8x8x8xf32> to vector<8x8xf32>
    %54 = vector.shape_cast %53 : vector<8x8xf32> to vector<8x8x1xf32>
    %55 = vector.broadcast %54 : vector<8x8x1xf32> to vector<8x8x8xf32>
    %56 = arith.divf %52, %55 : vector<8x8x8xf32>
    %c0_51 = arith.constant 0 : index
    %c0_52 = arith.constant 0 : index
    %c0_53 = arith.constant 0 : index
    %57 = vector.load %arg14[%c0_51, %c0_52, %c0_53] : memref<8x8x8xf32, #tpu.memory_space<vmem>>, vector<8x8x8xf32>
    tpu.vector_store %arg14[%c0_51, %c0_52, %c0_53], %56 {strides = array<i32>} : memref<8x8x8xf32, #tpu.memory_space<vmem>>, vector<8x8x8xf32>,
    "tpu.trace_start"() <{level = 10 : i32, message = "nqk,nkd->nqd"}> : () -> ()
    %cst_54 = arith.constant dense<0.000000e+00> : vector<8x8x8xf32>
    %58 = tpu.matmul %56, %44, %cst_54 {dimension_numbers = #tpu.dot_dimension_numbers<[2], [1], [1], [2], [0, 0, 0, 1, 1, 2], [0], [0]>} : vector<8x8x8xf32>, vector<8x8x8xf32>, vector<8x8x8xf32> -> vector<8x8x8xf32>
    "tpu.trace_stop"() : () -> ()
    %59 = vector.extract_strided_slice %58 {offsets = [0, 0, 0], sizes = [2, 8, 8], strides = [1, 1, 1]} : vector<8x8x8xf32> to vector<2x8x8xf32>
    %60 = vector.extract_strided_slice %58 {offsets = [2, 0, 0], sizes = [2, 8, 8], strides = [1, 1, 1]} : vector<8x8x8xf32> to vector<2x8x8xf32>
    %61 = vector.extract_strided_slice %58 {offsets = [4, 0, 0], sizes = [2, 8, 8], strides = [1, 1, 1]} : vector<8x8x8xf32> to vector<2x8x8xf32>
    %62 = vector.extract_strided_slice %58 {offsets = [6, 0, 0], sizes = [2, 8, 8], strides = [1, 1, 1]} : vector<8x8x8xf32> to vector<2x8x8xf32>
    %63 = tpu.concatenate %59, %60, %61, %62 in 2 : vector<2x8x8xf32>, vector<2x8x8xf32>, vector<2x8x8xf32>, vector<2x8x8xf32> -> vector<2x8x32xf32>
    %64 = vector.shape_cast %63 : vector<2x8x32xf32> to vector<16x32xf32>
    %c0_55 = arith.constant 0 : index
    %c0_56 = arith.constant 0 : index
    %65 = vector.load %arg3[%c0_55, %c0_56] : memref<32x32xf32, #tpu.memory_space<vmem>>, vector<32x32xf32>
    %cst_57 = arith.constant dense<0.000000e+00> : vector<16x32xf32>
    %66 = tpu.matmul %64, %65, %cst_57 {dimension_numbers = #tpu.dot_dimension_numbers<[1], [0], [0], [1], [0, 0, 1, 1], [], []>} : vector<16x32xf32>, vector<32x32xf32>, vector<16x32xf32> -> vector<16x32xf32>
    %c0_58 = arith.constant 0 : index
    %c0_59 = arith.constant 0 : index
    %67 = vector.load %arg4[%c0_58, %c0_59] : memref<1x32xf32, #tpu.memory_space<vmem>>, vector<1x32xf32>
    %68 = vector.broadcast %67 : vector<1x32xf32> to vector<16x32xf32>
    %69 = arith.addf %66, %68 : vector<16x32xf32>
    %70 = arith.addf %69, %0 : vector<16x32xf32>
    %c0_60 = arith.constant 0 : index
    %c0_61 = arith.constant 0 : index
    %71 = vector.load %arg5[%c0_60, %c0_61] : memref<1x32xf32, #tpu.memory_space<vmem>>, vector<1x32xf32>
    %c0_62 = arith.constant 0 : index
    %c0_63 = arith.constant 0 : index
    %72 = vector.load %arg6[%c0_62, %c0_63] : memref<1x32xf32, #tpu.memory_space<vmem>>, vector<1x32xf32>
    %cst_64 = arith.constant dense<0.000000e+00> : vector<16xf32>
    %73 = vector.multi_reduction <add>, %70, %cst_64 [1] : vector<16x32xf32> to vector<16xf32>
    %74 = vector.shape_cast %73 : vector<16xf32> to vector<16x1xf32>
    %cst_65 = arith.constant 3.200000e+01 : f32
    %75 = vector.broadcast %cst_65 : f32 to vector<16x1xf32>
    %76 = arith.divf %74, %75 : vector<16x1xf32>
    %77 = vector.broadcast %76 : vector<16x1xf32> to vector<16x32xf32>
    %78 = arith.subf %70, %77 : vector<16x32xf32>
    %79 = arith.mulf %78, %78 : vector<16x32xf32>
    %cst_66 = arith.constant dense<0.000000e+00> : vector<16xf32>
    %80 = vector.multi_reduction <add>, %79, %cst_66 [1] : vector<16x32xf32> to vector<16xf32>
    %81 = vector.shape_cast %80 : vector<16xf32> to vector<16x1xf32>
    %cst_67 = arith.constant 3.200000e+01 : f32
    %82 = vector.broadcast %cst_67 : f32 to vector<16x1xf32>
    %83 = arith.divf %81, %82 : vector<16x1xf32>
    %84 = vector.broadcast %76 : vector<16x1xf32> to vector<16x32xf32>
    %85 = arith.subf %70, %84 : vector<16x32xf32>
    %cst_68 = arith.constant 9.99999997E-7 : f32
    %86 = vector.broadcast %cst_68 : f32 to vector<16x1xf32>
    %87 = arith.addf %83, %86 : vector<16x1xf32>
    %88 = math.rsqrt %87 : vector<16x1xf32>
    %89 = vector.broadcast %88 : vector<16x1xf32> to vector<16x32xf32>
    %90 = arith.mulf %85, %89 : vector<16x32xf32>
    %91 = vector.broadcast %71 : vector<1x32xf32> to vector<16x32xf32>
    %92 = arith.mulf %90, %91 : vector<16x32xf32>
    %93 = vector.broadcast %72 : vector<1x32xf32> to vector<16x32xf32>
    %94 = arith.addf %92, %93 : vector<16x32xf32>
    %c0_69 = arith.constant 0 : index
    %c0_70 = arith.constant 0 : index
    %95 = vector.load %arg7[%c0_69, %c0_70] : memref<32x64xf32, #tpu.memory_space<vmem>>, vector<32x64xf32>
    %cst_71 = arith.constant dense<0.000000e+00> : vector<16x64xf32>
    %96 = tpu.matmul %94, %95, %cst_71 {dimension_numbers = #tpu.dot_dimension_numbers<[1], [0], [0], [1], [0, 0, 1, 1], [], []>} : vector<16x32xf32>, vector<32x64xf32>, vector<16x64xf32> -> vector<16x64xf32>
    %c0_72 = arith.constant 0 : index
    %c0_73 = arith.constant 0 : index
    %97 = vector.load %arg8[%c0_72, %c0_73] : memref<1x64xf32, #tpu.memory_space<vmem>>, vector<1x64xf32>
    %98 = vector.broadcast %97 : vector<1x64xf32> to vector<16x64xf32>
    %99 = arith.addf %96, %98 : vector<16x64xf32>
    %cst_74 = arith.constant 0.000000e+00 : f32
    %100 = vector.broadcast %cst_74 : f32 to vector<16x64xf32>
    %101 = arith.maximumf %99, %100 : vector<16x64xf32>
    %c0_75 = arith.constant 0 : index
    %c0_76 = arith.constant 0 : index
    %102 = vector.load %arg9[%c0_75, %c0_76] : memref<64x32xf32, #tpu.memory_space<vmem>>, vector<64x32xf32>
    %cst_77 = arith.constant dense<0.000000e+00> : vector<16x32xf32>
    %103 = tpu.matmul %101, %102, %cst_77 {dimension_numbers = #tpu.dot_dimension_numbers<[1], [0], [0], [1], [0, 0, 1, 1], [], []>} : vector<16x64xf32>, vector<64x32xf32>, vector<16x32xf32> -> vector<16x32xf32>
    %c0_78 = arith.constant 0 : index
    %c0_79 = arith.constant 0 : index
    %104 = vector.load %arg10[%c0_78, %c0_79] : memref<1x32xf32, #tpu.memory_space<vmem>>, vector<1x32xf32>
    %105 = vector.broadcast %104 : vector<1x32xf32> to vector<16x32xf32>
    %106 = arith.addf %103, %105 : vector<16x32xf32>
    %107 = arith.addf %106, %94 : vector<16x32xf32>
    %c0_80 = arith.constant 0 : index
    %c0_81 = arith.constant 0 : index
    %108 = vector.load %arg11[%c0_80, %c0_81] : memref<1x32xf32, #tpu.memory_space<vmem>>, vector<1x32xf32>
    %c0_82 = arith.constant 0 : index
    %c0_83 = arith.constant 0 : index
    %109 = vector.load %arg12[%c0_82, %c0_83] : memref<1x32xf32, #tpu.memory_space<vmem>>, vector<1x32xf32>
    %cst_84 = arith.constant dense<0.000000e+00> : vector<16xf32>
    %110 = vector.multi_reduction <add>, %107, %cst_84 [1] : vector<16x32xf32> to vector<16xf32>
    %111 = vector.shape_cast %110 : vector<16xf32> to vector<16x1xf32>
    %cst_85 = arith.constant 3.200000e+01 : f32
    %112 = vector.broadcast %cst_85 : f32 to vector<16x1xf32>
    %113 = arith.divf %111, %112 : vector<16x1xf32>
    %114 = vector.broadcast %113 : vector<16x1xf32> to vector<16x32xf32>
    %115 = arith.subf %107, %114 : vector<16x32xf32>
    %116 = arith.mulf %115, %115 : vector<16x32xf32>
    %cst_86 = arith.constant dense<0.000000e+00> : vector<16xf32>
    %117 = vector.multi_reduction <add>, %116, %cst_86 [1] : vector<16x32xf32> to vector<16xf32>
    %118 = vector.shape_cast %117 : vector<16xf32> to vector<16x1xf32>
    %cst_87 = arith.constant 3.200000e+01 : f32
    %119 = vector.broadcast %cst_87 : f32 to vector<16x1xf32>
    %120 = arith.divf %118, %119 : vector<16x1xf32>
    %121 = vector.broadcast %113 : vector<16x1xf32> to vector<16x32xf32>
    %122 = arith.subf %107, %121 : vector<16x32xf32>
    %cst_88 = arith.constant 9.99999997E-7 : f32
    %123 = vector.broadcast %cst_88 : f32 to vector<16x1xf32>
    %124 = arith.addf %120, %123 : vector<16x1xf32>
    %125 = math.rsqrt %124 : vector<16x1xf32>
    %126 = vector.broadcast %125 : vector<16x1xf32> to vector<16x32xf32>
    %127 = arith.mulf %122, %126 : vector<16x32xf32>
    %128 = vector.broadcast %108 : vector<1x32xf32> to vector<16x32xf32>
    %129 = arith.mulf %127, %128 : vector<16x32xf32>
    %130 = vector.broadcast %109 : vector<1x32xf32> to vector<16x32xf32>
    %131 = arith.addf %129, %130 : vector<16x32xf32>
    %c0_89 = arith.constant 0 : index
    %c0_90 = arith.constant 0 : index
    %132 = vector.load %arg13[%c0_89, %c0_90] : memref<16x32xf32, #tpu.memory_space<vmem>>, vector<16x32xf32>
    tpu.vector_store %arg13[%c0_89, %c0_90], %131 {strides = array<i32>} : memref<16x32xf32, #tpu.memory_space<vmem>>, vector<16x32xf32>,
    return
  }
}

</mosaic_0001>

<bundles_post_ra>
// kernel: encoder_layer.1
= control target key start
LH: loop header
LB: loop body
LE: loop exit
PB: predicated region body
PF: predicated region fallthrough
CT: control target
= control target key end

     0   :  { %vm60_vm0 = vcmask 261120   ;;  %s2776_s0 = inlined_call_operand.vmem [shape: f32[16,32], index: 0, kind: input, shape index: {}]   ;;  %s2777_s1 = inlined_call_operand.vmem [shape: f32[32,96], index: 1, kind: input, shape index: {}]   ;;  %s2778_s2 = inlined_call_operand.vmem [shape: f32[1,96], index: 2, kind: input, shape index: {}]   ;;  %s2779_s3 = inlined_call_operand.vmem [shape: f32[32,32], index: 3, kind: input, shape index: {}]   ;;  %s2780_s4 = inlined_call_operand.vmem [shape: f32[1,32], index: 4, kind: input, shape index: {}]   ;;  %s2781_s5 = inlined_call_operand.vmem [shape: f32[1,32], index: 5, kind: input, shape index: {}]   ;;  %s2782_s6 = inlined_call_operand.vmem [shape: f32[1,32], index: 6, kind: input, shape index: {}]   ;;  %s2783_s7 = inlined_call_operand.vmem [shape: f32[32,64], index: 7, kind: input, shape index: {}]   ;;  %s2784_s8 = inlined_call_operand.vmem [shape: f32[1,64], index: 8, kind: input, shape index: {}]   ;;  %s2785_s9 = inlined_call_operand.vmem [shape: f32[64,32], index: 9, kind: input, shape index: {}]   ;;  %s2786_s10 = inlined_call_operand.vmem [shape: f32[1,32], index: 10, kind: input, shape index: {}]   ;;  %s2787_s11 = inlined_call_operand.vmem [shape: f32[1,32], index: 11, kind: input, shape index: {}]   ;;  %s2788_s12 = inlined_call_operand.vmem [shape: f32[1,32], index: 12, kind: input, shape index: {}]   ;;  %s2789_s13 = inlined_call_operand.hbm [shape: f32[16,32], index: 13, kind: output, shape index: {0}]   ;;  %s2790_s14 = inlined_call_operand.vmem [shape: f32[8,8,8], index: 14, kind: output, shape index: {1}]  }
   0x1   :  { %v49_v0 = vld [vmem:[%s2777_s1] sm:$0xff]  ;;  %v50_v1 = vld [vmem:[%s2777_s1 + $0x8] sm:$0xff]  ;;  %v51_v2 = vld [vmem:[%s2777_s1 + $0x10] sm:$0xff] }
   0x2   :  { %v2226_v3 = vpack.c.bf16 %v50_v1, %v49_v0  ;;  %v52_v4 = vld [vmem:[%s2777_s1 + $0x18] sm:$0xff]  ;;  %v2456_v5 = vld [vmem:[%s2776_s0] sm:$0xff] }
   0x3   :  { %v2230_v6 = vpack.c.bf16 %v52_v4, %v51_v2  ;;  %2102 = vmatprep.mubr.msk.f32.mxu1 %vm60_vm0, %v2456_v5 }
   0x4   :  { %20 = vsyncpa [#allocation6], 0  ;;  %2227 = vmatprep.subr.bf16.mxu1 %v2226_v3  ;;  %v2463_v7 = vld [vmem:[%s2776_s0 + $0x8] sm:$0xff]  ;;  %v1994_v8 = vld [vmem:[%s2778_s2] ss:$0 sm:$0xff]  ;;  %v2348_v9 = vmov 0.0  }
   0x5   :  { %2229 = vmatpush3.bf16.msra.mxu1 %v2226_v3  ;;  %2115 = vmatprep.subr.mxu0 %v2348_v9  ;;  %vm142_vm1 = vcmask 64512   ;;  %s2349_s0 = smov 88   ;;  %s2350_s26 = smov 96   ;;  %vm2351_vm2 = vmmov 0   ;;  %vm1590_vm3 = vcmask 130048   ;;  %vm1593_vm4 = vcmask 195584  }
   0x6   :  { %2231 = vmatprep.subr.bf16.mxu1 %v2230_v6  ;;  %2117 = vmatprep.mubr.msk.f32.mxu0 %vm2351_vm2, %v2348_v9  ;;  %s2352_s2 = smov 120   ;;  %s2353_s27 = smov 80   ;;  %vm1844_vm5 = vcmask 523264  }
   0x7   :  { %s2354_s28 = smov 112   ;;  %s2355_s29 = smov 72  }
   0x8   :  { %s2356_s30 = smov 104   ;;  %s2357_s15 = smov 64  }
   0x9   :  { %2233 = vmatpush3.bf16.msra.mxu1 %v2230_v6  ;;  %s2358_s16 = smov 56   ;;  %s2359_s17 = smov 48  }
   0xa   :  { %2105 = vmatprep.subr.mxu1 %v2348_v9  ;;  %s2360_s18 = smov 40   ;;  %s2361_s23 = smov 8  }
   0xb   :  { %s2362_s24 = smov 16  }
   0xc   :  { %2103 = vmatmul.mubr.msk.f32.vlgmr.msra.gmra.mrb[0].mxu1 %vm60_vm0, %v2463_v7 }
   0xd   :  { %2107 = vmatprep.mubr.msk.f32.mxu1 %vm2351_vm2, %v2348_v9 }
  0xdf   :  { %v2104_v10 = vpop.f32.mrb[0].mxu1 }
  0xe0   :  { %v2472_v11 = vadd.f32 %v2104_v10, %v1994_v8  ;;  %v133_v12 = vpop.f32.mrb[1].mxu1 }
  0xe1   :  { %v2474_v13 = vadd.f32 %v1994_v8, %v133_v12 }
  0xe2   :  { %174 = vrot.lane.b32.xlu1 %v2472_v11, %s2349_s0  ;;  %149 = vrot.lane.b32.xlu0 %v2472_v11, %s2350_s26  ;;  %144 = vst.msk [vmem:[#allocation2 + $0x8] sm:$0xff] %vm142_vm1, %v2472_v11 }
  0xe3   :  { %143 = vst.msk [vmem:[#allocation2] sm:$0xff] %vm142_vm1, %v2474_v13 }
  0xe6   :  { %165 = vrot.lane.b32.xlu1 %v2472_v11, %s2352_s2  ;;  %147 = vrot.lane.b32.xlu0 %v2474_v13, %s2350_s26 }
  0xe9   :  { %v245_v27 = vld [vmem:[#allocation2 + $0x8] sm:$0xff] }
  0xea   :  { %201 = vrot.lane.b32.xlu1 %v2472_v11, %s2353_s27  ;;  %163 = vrot.lane.b32.xlu0 %v2474_v13, %s2352_s2  ;;  %v244_v23 = vld [vmem:[#allocation2] sm:$0xff] }
  0xee   :  { %172 = vrot.lane.b32.xlu1 %v2474_v13, %s2349_s0  ;;  %199 = vrot.lane.b32.xlu0 %v2474_v13, %s2353_s27 }
  0xf2   :  { %192 = vrot.lane.b32.xlu1 %v2472_v11, %s2354_s28  ;;  %190 = vrot.lane.b32.xlu0 %v2474_v13, %s2354_s28 }
  0xf6   :  { %228 = vrot.lane.b32.xlu1 %v2472_v11, %s2355_s29  ;;  %226 = vrot.lane.b32.xlu0 %v2474_v13, %s2355_s29 }
  0xfa   :  { %219 = vrot.lane.b32.xlu1 %v2472_v11, %s2356_s30  ;;  %217 = vrot.lane.b32.xlu0 %v2474_v13, %s2356_s30 }
 0x154   :  { %v175_v14 = vpop.permute.xlu1 %174  ;;  %v150_v15 = vpop.permute.xlu0 %149 }
 0x155   :  { %180 = vst.msk [vmem:[#allocation3 + $0x18] sm:$0xff] %vm142_vm1, %v175_v14  ;;  %154 = vst.msk [vmem:[#allocation3 + $0x8] sm:$0xff] %vm142_vm1, %v150_v15 }
 0x158   :  { %v166_v16 = vpop.permute.xlu1 %165  ;;  %v148_v17 = vpop.permute.xlu0 %147 }
 0x159   :  { %171 = vst.msk [vmem:[#allocation2 + $0x18] sm:$0xff] %vm142_vm1, %v166_v16  ;;  %153 = vst.msk [vmem:[#allocation3] sm:$0xff] %vm142_vm1, %v148_v17 }
 0x15c   :  { %v202_v18 = vpop.permute.xlu1 %201  ;;  %v164_v19 = vpop.permute.xlu0 %163  ;;  %v253_v26 = vld [vmem:[#allocation3 + $0x8] sm:$0xff]  ;;  %v255_v31 = vld [vmem:[#allocation3 + $0x18] sm:$0xff] }
 0x15d   :  { %207 = vst.msk [vmem:[#allocation3 + $0x28] sm:$0xff] %vm142_vm1, %v202_v18  ;;  %170 = vst.msk [vmem:[#allocation2 + $0x10] sm:$0xff] %vm142_vm1, %v164_v19 }
 0x160   :  { %v173_v20 = vpop.permute.xlu1 %172  ;;  %v200_v21 = vpop.permute.xlu0 %199  ;;  %v252_v22 = vld [vmem:[#allocation3] sm:$0xff]  ;;  %v247_v33 = vld [vmem:[#allocation2 + $0x18] sm:$0xff] }
 0x161   :  { %179 = vst.msk [vmem:[#allocation3 + $0x10] sm:$0xff] %vm142_vm1, %v173_v20  ;;  %206 = vst.msk [vmem:[#allocation3 + $0x20] sm:$0xff] %vm142_vm1, %v200_v21  ;;  %2106 = vmatpush3.xpose.msk.msra.mxu1 %vm142_vm1, %v252_v22 }
 0x162   :  { %2110 = vmatprep.subr.mxu1 %v2348_v9 }
 0x164   :  { %v193_v24 = vpop.permute.xlu1 %192  ;;  %v191_v25 = vpop.permute.xlu0 %190  ;;  %2108 = vmatmul.mubr.msk.f32.vlgmr.msra.gmra.mrb[2].mxu1 %vm142_vm1, %v244_v23  ;;  %v246_v32 = vld [vmem:[#allocation2 + $0x10] sm:$0xff]  ;;  %v257_v37 = vld [vmem:[#allocation3 + $0x28] sm:$0xff] }
 0x165   :  { %198 = vst.msk [vmem:[#allocation2 + $0x28] sm:$0xff] %vm142_vm1, %v193_v24  ;;  %197 = vst.msk [vmem:[#allocation2 + $0x20] sm:$0xff] %vm142_vm1, %v191_v25  ;;  %2111 = vmatpush3.xpose.msk.msra.mxu1 %vm142_vm1, %v253_v26  ;;  %2112 = vmatprep.mubr.msk.f32.mxu1 %vm2351_vm2, %v2348_v9 }
 0x166   :  { %2120 = vmatprep.subr.mxu1 %v2348_v9 }
 0x168   :  { %v229_v28 = vpop.permute.xlu1 %228  ;;  %v227_v29 = vpop.permute.xlu0 %226  ;;  %2113 = vmatmul.mubr.msk.f32.vlgmr.msra.gmra.mrb[4].mxu1 %vm142_vm1, %v245_v27  ;;  %v254_v30 = vld [vmem:[#allocation3 + $0x10] sm:$0xff]  ;;  %v256_v36 = vld [vmem:[#allocation3 + $0x20] sm:$0xff] }
 0x169   :  { %234 = vst.msk [vmem:[#allocation3 + $0x38] sm:$0xff] %vm142_vm1, %v229_v28  ;;  %233 = vst.msk [vmem:[#allocation3 + $0x30] sm:$0xff] %vm142_vm1, %v227_v29  ;;  %2116 = vmatpush3.xpose.msk.msra.mxu0 %vm142_vm1, %v254_v30  ;;  %2121 = vmatpush3.xpose.msk.msra.mxu1 %vm142_vm1, %v255_v31 }
 0x16a   :  { %2122 = vmatprep.mubr.msk.f32.mxu1 %vm2351_vm2, %v2348_v9  ;;  %2125 = vmatprep.subr.mxu0 %v2348_v9 }
 0x16b   :  { %2130 = vmatprep.subr.mxu1 %v2348_v9 }
 0x16c   :  { %v220_v34 = vpop.permute.xlu1 %219  ;;  %2118 = vmatmul.mubr.msk.f32.vlgmr.msra.gmra.mrb[0].mxu0 %vm142_vm1, %v246_v32  ;;  %v218_v35 = vpop.permute.xlu0 %217  ;;  %2123 = vmatmul.mubr.msk.f32.vlgmr.msra.gmra.mrb[6].mxu1 %vm142_vm1, %v247_v33  ;;  %v248_v38 = vld [vmem:[#allocation2 + $0x20] sm:$0xff]  ;;  %v249_v39 = vld [vmem:[#allocation2 + $0x28] sm:$0xff] }
 0x16d   :  { %225 = vst.msk [vmem:[#allocation2 + $0x38] sm:$0xff] %vm142_vm1, %v220_v34  ;;  %224 = vst.msk [vmem:[#allocation2 + $0x30] sm:$0xff] %vm142_vm1, %v218_v35  ;;  %2126 = vmatpush3.xpose.msk.msra.mxu0 %vm142_vm1, %v256_v36  ;;  %2131 = vmatpush3.xpose.msk.msra.mxu1 %vm142_vm1, %v257_v37 }
 0x16e   :  { %2127 = vmatprep.mubr.msk.f32.mxu0 %vm2351_vm2, %v2348_v9  ;;  %2132 = vmatprep.mubr.msk.f32.mxu1 %vm2351_vm2, %v2348_v9 }
 0x16f   :  { %2135 = vmatprep.subr.mxu0 %v2348_v9  ;;  %2140 = vmatprep.subr.mxu1 %v2348_v9 }
 0x170   :  { %2128 = vmatmul.mubr.msk.f32.vlgmr.msra.gmra.mrb[2].mxu0 %vm142_vm1, %v248_v38  ;;  %2133 = vmatmul.mubr.msk.f32.vlgmr.msra.gmra.mrb[8].mxu1 %vm142_vm1, %v249_v39  ;;  %v258_v40 = vld [vmem:[#allocation3 + $0x30] sm:$0xff]  ;;  %v259_v41 = vld [vmem:[#allocation3 + $0x38] sm:$0xff] }
 0x171   :  { %2136 = vmatpush3.xpose.msk.msra.mxu0 %vm142_vm1, %v258_v40  ;;  %2141 = vmatpush3.xpose.msk.msra.mxu1 %vm142_vm1, %v259_v41 }
 0x172   :  { %2137 = vmatprep.mubr.msk.f32.mxu0 %vm2351_vm2, %v2348_v9  ;;  %2142 = vmatprep.mubr.msk.f32.mxu1 %vm2351_vm2, %v2348_v9 }
 0x173   :  { %2145 = vmatprep.subr.mxu0 %v2348_v9  ;;  %2150 = vmatprep.subr.mxu1 %v2348_v9 }
 0x174   :  { %v250_v42 = vld [vmem:[#allocation2 + $0x30] sm:$0xff]  ;;  %v251_v43 = vld [vmem:[#allocation2 + $0x38] sm:$0xff] }
 0x175   :  { %2138 = vmatmul.mubr.msk.f32.vlgmr.msra.gmra.mrb[4].mxu0 %vm142_vm1, %v250_v42  ;;  %2143 = vmatmul.mubr.msk.f32.vlgmr.msra.gmra.mrb[10].mxu1 %vm142_vm1, %v251_v43 }
 0x176   :  { %2147 = vmatprep.mubr.msk.f32.mxu0 %vm2351_vm2, %v2348_v9  ;;  %2152 = vmatprep.mubr.msk.f32.mxu1 %vm2351_vm2, %v2348_v9 }
 0x237   :  { %v340_v44 = vpop.f32.mrb[2].mxu1 }
 0x238   :  { %v876_v45 = vmul.f32 0.35355338, %v340_v44  ;;  %v2109_v46 = vpop.f32.mrb[3].mxu1 }
 0x23a   :  { %v884_v47 = vsel %vm142_vm1, %v876_v45, -inf }
 0x23b   :  { %885 = vmax.xlane.f32.xlu0 %v884_v47  ;;  %v416_v48 = vpop.f32.mrb[4].mxu1 }
 0x23c   :  { %v877_v49 = vmul.f32 0.35355338, %v416_v48  ;;  %v2114_v50 = vpop.f32.mrb[5].mxu1 }
 0x23e   :  { %v887_v51 = vsel %vm142_vm1, %v877_v49, -inf }
 0x23f   :  { %v492_v52 = vpop.f32.mrb[0].mxu0  ;;  %888 = vmax.xlane.f32.xlu1 %v887_v51  ;;  %v568_v53 = vpop.f32.mrb[6].mxu1 }
 0x240   :  { %v878_v54 = vmul.f32 0.35355338, %v492_v52  ;;  %v2119_v55 = vpop.f32.mrb[1].mxu0  ;;  %v2124_v56 = vpop.f32.mrb[7].mxu1  ;;  %v879_v57 = vmul.f32 0.35355338, %v568_v53 }
 0x242   :  { %v890_v58 = vsel %vm142_vm1, %v878_v54, -inf  ;;  %v893_v2 = vsel %vm142_vm1, %v879_v57, -inf }
 0x243   :  { %v644_v59 = vpop.f32.mrb[2].mxu0  ;;  %891 = vmax.xlane.f32.xlu0 %v890_v58  ;;  %v720_v60 = vpop.f32.mrb[8].mxu1 }
 0x244   :  { %v880_v61 = vmul.f32 0.35355338, %v644_v59  ;;  %v2129_v62 = vpop.f32.mrb[3].mxu0  ;;  %v2134_v63 = vpop.f32.mrb[9].mxu1  ;;  %v881_v0 = vmul.f32 0.35355338, %v720_v60 }
 0x246   :  { %v896_v1 = vsel %vm142_vm1, %v880_v61, -inf  ;;  %v899_v14 = vsel %vm142_vm1, %v881_v0, -inf }
 0x247   :  { %897 = vmax.xlane.f32.xlu1 %v896_v1  ;;  %894 = vmax.xlane.f32.xlu0 %v893_v2 }
 0x248   :  { %v796_v3 = vpop.f32.mrb[4].mxu0  ;;  %v872_v4 = vpop.f32.mrb[10].mxu1 }
 0x249   :  { %v882_v6 = vmul.f32 0.35355338, %v796_v3  ;;  %v2139_v8 = vpop.f32.mrb[5].mxu0  ;;  %v2144_v10 = vpop.f32.mrb[11].mxu1  ;;  %v883_v12 = vmul.f32 0.35355338, %v872_v4 }
 0x24b   :  { %900 = vmax.xlane.f32.xlu0 %v899_v14  ;;  %v902_v15 = vsel %vm142_vm1, %v882_v6, -inf  ;;  %v905_v16 = vsel %vm142_vm1, %v883_v12, -inf }
 0x24c   :  { %903 = vmax.xlane.f32.xlu1 %v902_v15 }
 0x24f   :  { %906 = vmax.xlane.f32.xlu0 %v905_v16 }
 0x25d   :  { %155 = vrot.lane.b32.xlu1 %v2474_v13, %s2357_s15 }
 0x261   :  { %181 = vrot.lane.b32.xlu1 %v2474_v13, %s2358_s16 }
 0x265   :  { %183 = vrot.lane.b32.xlu1 %v2472_v11, %s2358_s16  ;;  %157 = vrot.lane.b32.xlu0 %v2472_v11, %s2357_s15  ;;  %s2364_s16 = smov [#allocation5]  }
 0x269   :  { %210 = vrot.lane.b32.xlu1 %v2472_v11, %s2359_s17  ;;  %208 = vrot.lane.b32.xlu0 %v2474_v13, %s2359_s17  ;;  %s1979_s17 = sshll.u32 %s2364_s16, 4  ;;  %s1980_s17 = int_to_ptr.vmem [resolvable:$true] %s1979_s17 }
 0x26a   :  { %p2329_p1 = scmp.lt.s32.totalorder %s1980_s17, %s1980_s17 }
 0x2c8   :  { %v886_v17 = vpop.xlane.xlu0 %885 }
 0x2c9   :  { %v908_v18 = vsub.f32 %v876_v45, %v886_v17 }
 0x2cb   :  { %v916_v19 = vmul.f32 1.442695, %v908_v18 }
 0x2cc   :  { %v889_v20 = vpop.xlane.xlu1 %888 }
 0x2cd   :  { %2284 = vpow2.f32 %v916_v19  ;;  %v909_v21 = vsub.f32 %v877_v49, %v889_v20 }
 0x2cf   :  { %v918_v22 = vmul.f32 1.442695, %v909_v21 }
 0x2d0   :  { %v892_v23 = vpop.xlane.xlu0 %891 }
 0x2d1   :  { %2286 = vpow2.f32 %v918_v22  ;;  %v910_v24 = vsub.f32 %v878_v54, %v892_v23 }
 0x2d3   :  { %v920_v25 = vmul.f32 1.442695, %v910_v24 }
 0x2d4   :  { %v898_v26 = vpop.xlane.xlu1 %897  ;;  %v895_v27 = vpop.xlane.xlu0 %894 }
 0x2d5   :  { %2288 = vpow2.f32 %v920_v25  ;;  %v912_v28 = vsub.f32 %v880_v61, %v898_v26  ;;  %v911_v29 = vsub.f32 %v879_v57, %v895_v27 }
 0x2d7   :  { %v2566_v30 = vpop.eup %2284  ;;  %v924_v31 = vmul.f32 1.442695, %v912_v28  ;;  %v922_v32 = vmul.f32 1.442695, %v911_v29 }
 0x2d8   :  { %v901_v33 = vpop.xlane.xlu0 %900  ;;  %v932_v34 = vsel %vm142_vm1, %v2566_v30, 0.0 }
 0x2d9   :  { %2290 = vpow2.f32 %v924_v31  ;;  %v913_v35 = vsub.f32 %v881_v0, %v901_v33  ;;  %933 = vadd.xlane.f32.xlu1 %v932_v34  ;;  %v904_v36 = vpop.xlane.xlu1 %903 }
 0x2da   :  { %2292 = vpow2.f32 %v922_v32  ;;  %v914_v37 = vsub.f32 %v882_v6, %v904_v36 }
 0x2db   :  { %v2570_v38 = vpop.eup %2286  ;;  %v926_v39 = vmul.f32 1.442695, %v913_v35 }
 0x2dc   :  { %v928_v40 = vmul.f32 1.442695, %v914_v37  ;;  %v907_v41 = vpop.xlane.xlu0 %906  ;;  %v935_v42 = vsel %vm142_vm1, %v2570_v38, 0.0 }
 0x2dd   :  { %2294 = vpow2.f32 %v926_v39  ;;  %v915_v43 = vsub.f32 %v883_v12, %v907_v41  ;;  %v156_v44 = vpop.permute.xlu1 %155  ;;  %936 = vadd.xlane.f32.xlu0 %v935_v42  ;;  %v1598_v42 = vld [vmem:[%s2779_s3 + $0x10] sm:$0xff] }
 0x2de   :  { %2296 = vpow2.f32 %v928_v40  ;;  %161 = vst.msk [vmem:[#allocation4] sm:$0xff] %vm142_vm1, %v156_v44 }
 0x2df   :  { %v2575_v45 = vpop.eup %2288  ;;  %v930_v46 = vmul.f32 1.442695, %v915_v43  ;;  %v1599_v43 = vld [vmem:[%s2779_s3 + $0x18] sm:$0xff] }
 0x2e0   :  { %v158_v47 = vpop.permute.xlu0 %157  ;;  %v938_v48 = vsel %vm142_vm1, %v2575_v45, 0.0  ;;  %v2238_v44 = vpack.c.bf16 %v1599_v43, %v1598_v42 }
 0x2e1   :  { %2298 = vpow2.f32 %v930_v46  ;;  %162 = vst.msk [vmem:[#allocation4 + $0x8] sm:$0xff] %vm142_vm1, %v158_v47  ;;  %939 = vadd.xlane.f32.xlu1 %v938_v48  ;;  %v182_v49 = vpop.permute.xlu1 %181 }
 0x2e2   :  { %188 = vst.msk [vmem:[#allocation4 + $0x10] sm:$0xff] %vm142_vm1, %v182_v49 }
 0x2e3   :  { %v2581_v50 = vpop.eup %2290 }
 0x2e4   :  { %v2583_v51 = vpop.eup %2292  ;;  %v209_v52 = vpop.permute.xlu0 %208  ;;  %v944_v53 = vsel %vm142_vm1, %v2581_v50, 0.0 }
 0x2e5   :  { %215 = vst.msk [vmem:[#allocation4 + $0x20] sm:$0xff] %vm142_vm1, %v209_v52  ;;  %945 = vadd.xlane.f32.xlu1 %v944_v53  ;;  %v184_v54 = vpop.permute.xlu1 %183  ;;  %v941_v55 = vsel %vm142_vm1, %v2583_v51, 0.0  ;;  %v260_v56 = vld [vmem:[#allocation4] sm:$0xff] }
 0x2e6   :  { %189 = vst.msk [vmem:[#allocation4 + $0x18] sm:$0xff] %vm142_vm1, %v184_v54  ;;  %942 = vadd.xlane.f32.xlu0 %v941_v55  ;;  %2146 = vmatpush3.msra.mxu0 %v260_v56 }
 0x2e7   :  { %v2591_v57 = vpop.eup %2294  ;;  %2155 = vmatprep.subr.mxu0 %v2348_v9 }
 0x2e8   :  { %v2594_v58 = vpop.eup %2296  ;;  %v947_v59 = vsel %vm142_vm1, %v2591_v57, 0.0  ;;  %v261_v60 = vld [vmem:[#allocation4 + $0x8] sm:$0xff] }
 0x2e9   :  { %v211_v61 = vpop.permute.xlu1 %210  ;;  %2151 = vmatpush3.msra.mxu1 %v261_v60  ;;  %v950_v62 = vsel %vm142_vm1, %v2594_v58, 0.0 }
 0x2ea   :  { %216 = vst.msk [vmem:[#allocation4 + $0x28] sm:$0xff] %vm142_vm1, %v211_v61  ;;  %948 = vadd.xlane.f32.xlu0 %v947_v59  ;;  %951 = vadd.xlane.f32.xlu1 %v950_v62 }
 0x2eb   :  { %v2601_v63 = vpop.eup %2298  ;;  %2160 = vmatprep.subr.mxu1 %v2348_v9 }
 0x2ec   :  { %v953_v0 = vsel %vm142_vm1, %v2601_v63, 0.0  ;;  %v264_v21 = vld [vmem:[#allocation4 + $0x20] sm:$0xff] }
 0x2ed   :  { %v263_v16 = vld [vmem:[#allocation4 + $0x18] sm:$0xff] }
 0x2ee   :  { %954 = vadd.xlane.f32.xlu0 %v953_v0 }
 0x2f1   :  { %v265_v27 = vld [vmem:[#allocation4 + $0x28] sm:$0xff] }
 0x2fb   :  { %237 = vrot.lane.b32.xlu1 %v2472_v11, %s2360_s18  ;;  %v262_v11 = vld [vmem:[#allocation4 + $0x10] sm:$0xff] }
 0x304   :  { %235 = vrot.lane.b32.xlu0 %v2474_v13, %s2360_s18  ;;  %s2324_s18 = scalar_lea.vmem %s1980_s17, 256 }
 0x305   :  { %p2325_p0 = scmp.ne.s32.totalorder %s1980_s17, %s2324_s18  ;;  %p2330_p2 = scmp.lt.s32.totalorder %s2324_s18, %s2324_s18 }
 0x307   :  { %p2331_p3 = por %p2330_p2, %p2329_p1 }
 0x309   :  { %p2332_p4 = pnand %p2331_p3, %p2325_p0 }
 0x366   :  { %v934_v1 = vpop.xlane.xlu1 %933 }
 0x367   :  { %2300 = vrcp.f32 %v934_v1 }
 0x36a   :  { %v937_v2 = vpop.xlane.xlu0 %936 }
 0x36b   :  { %2302 = vrcp.f32 %v937_v2 }
 0x36e   :  { %v940_v3 = vpop.xlane.xlu1 %939 }
 0x36f   :  { %2304 = vrcp.f32 %v940_v3 }
 0x371   :  { %v2301_v4 = vpop.eup %2300 }
 0x372   :  { %v957_v6 = vmul.f32 %v2301_v4, %v2566_v30  ;;  %v946_v8 = vpop.xlane.xlu1 %945 }
 0x373   :  { %2306 = vrcp.f32 %v946_v8  ;;  %v943_v10 = vpop.xlane.xlu0 %942 }
 0x374   :  { %972 = vst.msk [vmem:[%s2790_s14] sm:$0xff] %vm142_vm1, %v957_v6  ;;  %2308 = vrcp.f32 %v943_v10  ;;  %2148 = vmatmul.mubr.msk.f32.vlgmr.msra.gmra.mrb[6].mxu0 %vm142_vm1, %v957_v6  ;;  %v2021_v6 = vld [vmem:[%s2780_s4] ss:$0 sm:$0xff] }
 0x375   :  { %v2303_v13 = vpop.eup %2302  ;;  %2156 = vmatpush3.msra.mxu0 %v262_v11  ;;  %2157 = vmatprep.mubr.msk.f32.mxu0 %vm2351_vm2, %v2348_v9 }
 0x376   :  { %v959_v12 = vmul.f32 %v2303_v13, %v2570_v38  ;;  %2165 = vmatprep.subr.mxu0 %v2348_v9  ;;  %v1596_v38 = vld [vmem:[%s2779_s3] sm:$0xff] }
 0x377   :  { %v949_v14 = vpop.xlane.xlu0 %948  ;;  %v952_v15 = vpop.xlane.xlu1 %951 }
 0x378   :  { %973 = vst.msk [vmem:[%s2790_s14 + $0x8] sm:$0xff] %vm142_vm1, %v959_v12  ;;  %2310 = vrcp.f32 %v949_v14  ;;  %2153 = vmatmul.mubr.msk.f32.vlgmr.msra.gmra.mrb[12].mxu1 %vm142_vm1, %v959_v12 }
 0x379   :  { %v2305_v17 = vpop.eup %2304  ;;  %2312 = vrcp.f32 %v952_v15  ;;  %2161 = vmatpush3.msra.mxu1 %v263_v16  ;;  %2162 = vmatprep.mubr.msk.f32.mxu1 %vm2351_vm2, %v2348_v9 }
 0x37a   :  { %v961_v18 = vmul.f32 %v2305_v17, %v2575_v45  ;;  %2170 = vmatprep.subr.mxu1 %v2348_v9 }
 0x37b   :  { %v955_v19 = vpop.xlane.xlu0 %954  ;;  %v238_v20 = vpop.permute.xlu1 %237 }
 0x37c   :  { %974 = vst.msk [vmem:[%s2790_s14 + $0x10] sm:$0xff] %vm142_vm1, %v961_v18  ;;  %2314 = vrcp.f32 %v955_v19  ;;  %243 = vst.msk [vmem:[#allocation4 + $0x38] sm:$0xff] %vm142_vm1, %v238_v20  ;;  %2158 = vmatmul.mubr.msk.f32.vlgmr.msra.gmra.mrb[8].mxu0 %vm142_vm1, %v961_v18 }
 0x37d   :  { %v2307_v22 = vpop.eup %2306  ;;  %2166 = vmatpush3.msra.mxu0 %v264_v21  ;;  %2167 = vmatprep.mubr.msk.f32.mxu0 %vm2351_vm2, %v2348_v9 }
 0x37e   :  { %v2309_v23 = vpop.eup %2308  ;;  %v965_v24 = vmul.f32 %v2307_v22, %v2581_v50  ;;  %2175 = vmatprep.subr.mxu0 %v2348_v9 }
 0x37f   :  { %v963_v25 = vmul.f32 %v2309_v23, %v2583_v51  ;;  %v236_v26 = vpop.permute.xlu0 %235 }
 0x380   :  { %976 = vst.msk [vmem:[%s2790_s14 + $0x20] sm:$0xff] %vm142_vm1, %v965_v24  ;;  %242 = vst.msk [vmem:[#allocation4 + $0x30] sm:$0xff] %vm142_vm1, %v236_v26  ;;  %2168 = vmatmul.mubr.msk.f32.vlgmr.msra.gmra.mrb[10].mxu0 %vm142_vm1, %v965_v24  ;;  %v1736_v26 = vld [vmem:[%s2783_s7 + $0x8] sm:$0xff] }
 0x381   :  { %975 = vst.msk [vmem:[%s2790_s14 + $0x18] sm:$0xff] %vm142_vm1, %v963_v25  ;;  %2163 = vmatmul.mubr.msk.f32.vlgmr.msra.gmra.mrb[14].mxu1 %vm142_vm1, %v963_v25  ;;  %2177 = vmatprep.mubr.msk.f32.mxu0 %vm2351_vm2, %v2348_v9 }
 0x382   :  { %v2311_v28 = vpop.eup %2310  ;;  %2171 = vmatpush3.msra.mxu1 %v265_v27  ;;  %2172 = vmatprep.mubr.msk.f32.mxu1 %vm2351_vm2, %v2348_v9 }
 0x383   :  { %v2313_v29 = vpop.eup %2312  ;;  %v967_v30 = vmul.f32 %v2311_v28, %v2591_v57  ;;  %2180 = vmatprep.subr.mxu1 %v2348_v9  ;;  %v267_v31 = vld [vmem:[#allocation4 + $0x38] sm:$0xff]  ;;  %v1737_v28 = vld [vmem:[%s2783_s7 + $0x10] sm:$0xff] }
 0x384   :  { %v969_v32 = vmul.f32 %v2313_v29, %v2594_v58  ;;  %v1738_v29 = vld [vmem:[%s2783_s7 + $0x18] sm:$0xff] }
 0x385   :  { %977 = vst.msk [vmem:[%s2790_s14 + $0x28] sm:$0xff] %vm142_vm1, %v967_v30  ;;  %2173 = vmatmul.mubr.msk.f32.vlgmr.msra.gmra.mrb[16].mxu1 %vm142_vm1, %v967_v30  ;;  %v2246_v30 = vpack.c.bf16 %v1738_v29, %v1737_v28  ;;  %v2032_v28 = vld [vmem:[%s2787_s11] ss:$0 sm:$0xff] }
 0x386   :  { %v2315_v33 = vpop.eup %2314  ;;  %978 = vst.msk [vmem:[%s2790_s14 + $0x30] sm:$0xff] %vm142_vm1, %v969_v32  ;;  %2181 = vmatpush3.msra.mxu1 %v267_v31  ;;  %2182 = vmatprep.mubr.msk.f32.mxu1 %vm2351_vm2, %v2348_v9  ;;  %v1597_v9 = vld [vmem:[%s2779_s3 + $0x8] sm:$0xff]  ;;  %s2363_s3 = smov 24   ;;  %v1829_v31 = vld [vmem:[%s2785_s9] sm:$0xff] }
 0x387   :  { %v971_v34 = vmul.f32 %v2315_v33, %v2601_v63  ;;  %v266_v35 = vld [vmem:[#allocation4 + $0x30] sm:$0xff]  ;;  %v2234_v39 = vpack.c.bf16 %v1597_v9, %v1596_v38  ;;  %v1834_v38 = vld [vmem:[%s2785_s9 + $0x28] sm:$0xff] }
 0x388   :  { %2176 = vmatpush3.msra.mxu0 %v266_v35  ;;  %v1831_v33 = vld [vmem:[%s2785_s9 + $0x10] sm:$0xff]  ;;  %v1832_v35 = vld [vmem:[%s2785_s9 + $0x18] sm:$0xff] }
 0x389   :  { %979 = vst.msk [vmem:[%s2790_s14 + $0x38] sm:$0xff] %vm142_vm1, %v971_v34  ;;  %2178 = vmatmul.mubr.msk.f32.vlgmr.msra.gmra.mrb[12].mxu0 %vm142_vm1, %v969_v32  ;;  %2183 = vmatmul.mubr.msk.f32.vlgmr.msra.gmra.mrb[18].mxu1 %vm142_vm1, %v971_v34  ;;  %v1830_v32 = vld [vmem:[%s2785_s9 + $0x8] sm:$0xff] }
 0x38a   :  { %2235 = vmatprep.subr.bf16.mxu0 %v2234_v39  ;;  %v2250_v34 = vpack.c.bf16 %v1830_v32, %v1829_v31  ;;  %v2033_v32 = vld [vmem:[%s2788_s12] ss:$0 sm:$0xff] }
 0x38b   :  { %2237 = vmatpush3.bf16.msra.mxu0 %v2234_v39 }
 0x38c   :  { %2239 = vmatprep.subr.bf16.mxu0 %v2238_v44 }
 0x38f   :  { %2241 = vmatpush3.bf16.msra.mxu0 %v2238_v44 }
 0x390   :  { %2251 = vmatprep.subr.bf16.mxu0 %v2250_v34 }
 0x447   :  { %v1049_v36 = vpop.f32.mrb[6].mxu0 }
 0x448   :  { %v2149_v37 = vpop.f32.mrb[7].mxu0 }
 0x449   :  { %v1833_v37 = vld [vmem:[%s2785_s9 + $0x20] sm:$0xff] }
 0x44a   :  { %v2258_v9 = vpack.c.bf16 %v1834_v38, %v1833_v37 }
 0x44b   :  { %v1122_v40 = vpop.f32.mrb[12].mxu1 }
 0x44c   :  { %v2154_v41 = vpop.f32.mrb[13].mxu1 }
 0x44f   :  { %v1195_v45 = vpop.f32.mrb[8].mxu0 }
 0x450   :  { %v2159_v46 = vpop.f32.mrb[9].mxu0  ;;  %1566 = vrot.lane.b32.xlu0 %v1195_v45, %s2361_s23 }
 0x451   :  { %v2024_v46 = vld [vmem:[%s2781_s5] ss:$0 sm:$0xff] }
 0x453   :  { %v1341_v47 = vpop.f32.mrb[10].mxu0 }
 0x454   :  { %v1268_v48 = vpop.f32.mrb[14].mxu1  ;;  %1574 = vrot.lane.b32.xlu0 %v1341_v47, %s2362_s24  ;;  %v2169_v49 = vpop.f32.mrb[11].mxu0 }
 0x455   :  { %1568 = vrot.lane.b32.xlu1 %v1268_v48, %s2361_s23  ;;  %v2164_v50 = vpop.f32.mrb[15].mxu1  ;;  %v2025_v48 = vld [vmem:[%s2782_s6] ss:$0 sm:$0xff] }
 0x458   :  { %v1414_v51 = vpop.f32.mrb[16].mxu1 }
 0x459   :  { %1576 = vrot.lane.b32.xlu1 %v1414_v51, %s2362_s24  ;;  %v2174_v52 = vpop.f32.mrb[17].mxu1 }
 0x45c   :  { %v1487_v53 = vpop.f32.mrb[12].mxu0  ;;  %v1560_v54 = vpop.f32.mrb[18].mxu1 }
 0x45d   :  { %1582 = vrot.lane.b32.xlu0 %v1487_v53, %s2363_s3  ;;  %v2179_v55 = vpop.f32.mrb[13].mxu0  ;;  %1584 = vrot.lane.b32.xlu1 %v1560_v54, %s2363_s3  ;;  %v2184_v56 = vpop.f32.mrb[19].mxu1 }
 0x45e   :  { %v1835_v55 = vld [vmem:[%s2785_s9 + $0x30] sm:$0xff]  ;;  %v1836_v56 = vld [vmem:[%s2785_s9 + $0x38] sm:$0xff] }
 0x4c2   :  { %v1567_v57 = vpop.permute.xlu0 %1566 }
 0x4c3   :  { %v1588_v61 = vsel %vm142_vm1, %v1049_v36, %v1567_v57  ;;  %v2254_v36 = vpack.c.bf16 %v1832_v35, %v1831_v33  ;;  %v2262_v57 = vpack.c.bf16 %v1836_v56, %v1835_v55 }
 0x4c6   :  { %v1575_v59 = vpop.permute.xlu0 %1574 }
 0x4c7   :  { %v1569_v58 = vpop.permute.xlu1 %1568  ;;  %v1591_v63 = vsel %vm1590_vm3, %v1588_v61, %v1575_v59 }
 0x4c8   :  { %v1589_v62 = vsel %vm142_vm1, %v1122_v40, %v1569_v58  ;;  %v2026_v58 = vld [vmem:[%s2784_s8] ss:$0 sm:$0xff] }
 0x4cb   :  { %v1577_v60 = vpop.permute.xlu1 %1576 }
 0x4cc   :  { %v1592_v0 = vsel %vm1590_vm3, %v1589_v62, %v1577_v60 }
 0x4cf   :  { %v1583_v1 = vpop.permute.xlu0 %1582  ;;  %v1585_v2 = vpop.permute.xlu1 %1584 }
 0x4d0   :  { %v1594_v3 = vsel %vm1593_vm4, %v1591_v63, %v1583_v1  ;;  %v1595_v4 = vsel %vm1593_vm4, %v1592_v0, %v1585_v2  ;;  %v2029_v1 = vld [vmem:[%s2786_s10] ss:$0 sm:$0xff] }
 0x4d1   :  { %2193 = vmatprep.mubr.msk.f32.mxu0 %vm60_vm0, %v1594_v3 }
 0x4d2   :  { %2194 = vmatmul.mubr.msk.f32.vlgmr.msra.gmra.mrb[14].mxu0 %vm60_vm0, %v1595_v4 }
 0x4d3   :  { %2253 = vmatpush3.bf16.msra.mxu0 %v2250_v34 }
 0x4d4   :  { %2255 = vmatprep.subr.bf16.mxu0 %v2254_v36 }
 0x4d7   :  { %2257 = vmatpush3.bf16.msra.mxu0 %v2254_v36 }
 0x4d8   :  { %2259 = vmatprep.subr.bf16.mxu0 %v2258_v9 }
 0x4db   :  { %2261 = vmatpush3.bf16.msra.mxu0 %v2258_v9 }
 0x4dc   :  { %2263 = vmatprep.subr.bf16.mxu0 %v2262_v57 }
 0x4df   :  { %2265 = vmatpush3.bf16.msra.mxu0 %v2262_v57 }
 0x5a5   :  { %v2195_v8 = vpop.f32.mrb[14].mxu0 }
 0x5a6   :  { %v1685_v10 = vadd.f32 %v2195_v8, %v2021_v6  ;;  %v1679_v11 = vpop.f32.mrb[15].mxu0 }
 0x5a7   :  { %v1680_v13 = vadd.f32 %v2021_v6, %v1679_v11 }
 0x5a8   :  { %v1689_v12 = vadd.f32 %v1685_v10, %v2463_v7 }
 0x5a9   :  { %v1688_v14 = vadd.f32 %v1680_v13, %v2456_v5  ;;  %v1735_v5 = vld [vmem:[%s2783_s7] sm:$0xff] }
 0x5aa   :  { %v1695_v15 = vsel %vm60_vm0, %v1689_v12, 0.0  ;;  %v2242_v27 = vpack.c.bf16 %v1736_v26, %v1735_v5 }
 0x5ab   :  { %1696 = vadd.xlane.f32.xlu1 %v1695_v15  ;;  %v1692_v16 = vsel %vm60_vm0, %v1688_v14, 0.0 }
 0x5ac   :  { %1693 = vadd.xlane.f32.xlu0 %v1692_v16  ;;  %2243 = vmatprep.subr.bf16.mxu1 %v2242_v27 }
 0x5ad   :  { %2245 = vmatpush3.bf16.msra.mxu1 %v2242_v27 }
 0x5ae   :  { %2247 = vmatprep.subr.bf16.mxu1 %v2246_v30 }
 0x5b1   :  { %2249 = vmatpush3.bf16.msra.mxu1 %v2246_v30 }
 0x638   :  { %v1697_v17 = vpop.xlane.xlu1 %1696 }
 0x639   :  { %v1700_v18 = vmul.f32 0.03125, %v1697_v17  ;;  %v1694_v19 = vpop.xlane.xlu0 %1693 }
 0x63a   :  { %v1699_v20 = vmul.f32 0.03125, %v1694_v19 }
 0x63b   :  { %v1702_v21 = vsub.f32 %v1689_v12, %v1700_v18 }
 0x63c   :  { %v1701_v22 = vsub.f32 %v1688_v14, %v1699_v20 }
 0x63d   :  { %v1704_v25 = vmul.f32 %v1702_v21, %v1702_v21 }
 0x63e   :  { %v1703_v23 = vmul.f32 %v1701_v22, %v1701_v22 }
 0x63f   :  { %v1708_v7 = vsel %vm60_vm0, %v1704_v25, 0.0 }
 0x640   :  { %v1705_v24 = vsel %vm60_vm0, %v1703_v23, 0.0 }
 0x641   :  { %1706 = vadd.xlane.f32.xlu0 %v1705_v24 }
 0x645   :  { %1709 = vadd.xlane.f32.xlu0 %v1708_v7 }
 0x6ce   :  { %v1707_v39 = vpop.xlane.xlu0 %1706 }
 0x6cf   :  { %v1711_v40 = vmul.f32 0.03125, %v1707_v39 }
 0x6d1   :  { %v1713_v41 = vadd.f32 1e-06, %v1711_v40 }
 0x6d2   :  { %v1710_v42 = vpop.xlane.xlu0 %1709 }
 0x6d3   :  { %2316 = vrsqrt.f32 %v1713_v41  ;;  %v1712_v43 = vmul.f32 0.03125, %v1710_v42 }
 0x6d5   :  { %v1714_v44 = vadd.f32 1e-06, %v1712_v43 }
 0x6d7   :  { %2318 = vrsqrt.f32 %v1714_v44 }
 0x6dd   :  { %v2317_v45 = vpop.eup %2316 }
 0x6de   :  { %v1717_v47 = vmul.f32 %v2317_v45, %v1701_v22 }
 0x6e0   :  { %v1725_v49 = vmul.f32 %v2024_v46, %v1717_v47 }
 0x6e1   :  { %v2319_v50 = vpop.eup %2318 }
 0x6e2   :  { %v1718_v51 = vmul.f32 %v2319_v50, %v1702_v21  ;;  %v1733_v52 = vadd.f32 %v2025_v48, %v1725_v49 }
 0x6e4   :  { %v1726_v53 = vmul.f32 %v2024_v46, %v1718_v51  ;;  %2204 = vmatprep.mubr.msk.f32.mxu1 %vm60_vm0, %v1733_v52 }
 0x6e6   :  { %v1734_v54 = vadd.f32 %v2025_v48, %v1726_v53 }
 0x6e8   :  { %2205 = vmatmul.mubr.msk.f32.vlgmr.msra.gmra.mrb[20].mxu1 %vm60_vm0, %v1734_v54 }
 0x7bb   :  { %v2206_v59 = vpop.f32.mrb[20].mxu1 }
 0x7bc   :  { %v1824_v60 = vadd.f32 %v2206_v59, %v2026_v58  ;;  %v1818_v61 = vpop.f32.mrb[21].mxu1 }
 0x7bd   :  { %v1819_v62 = vadd.f32 %v2026_v58, %v1818_v61 }
 0x7be   :  { %v1828_v0 = vmax.f32 %v1824_v60, 0.0 }
 0x7bf   :  { %v1827_v63 = vmax.f32 %v1819_v62, 0.0 }
 0x7c1   :  { %2223 = vmatprep.mubr.msk.f32.mxu0 %vm1844_vm5, %v1827_v63 }
 0x7c2   :  { %2224 = vmatmul.mubr.msk.f32.vlgmr.msra.gmra.mrb[16].mxu0 %vm1844_vm5, %v1828_v0 }
 0x895   :  { %v2225_v2 = vpop.f32.mrb[16].mxu0 }
 0x896   :  { %v1923_v3 = vadd.f32 %v2225_v2, %v2029_v1  ;;  %v1917_v4 = vpop.f32.mrb[17].mxu0 }
 0x897   :  { %v1918_v6 = vadd.f32 %v2029_v1, %v1917_v4 }
 0x898   :  { %v1927_v8 = vadd.f32 %v1923_v3, %v1734_v54 }
 0x899   :  { %v1926_v10 = vadd.f32 %v1918_v6, %v1733_v52 }
 0x89a   :  { %v1933_v11 = vsel %vm60_vm0, %v1927_v8, 0.0 }
 0x89b   :  { %1934 = vadd.xlane.f32.xlu0 %v1933_v11  ;;  %v1930_v13 = vsel %vm60_vm0, %v1926_v10, 0.0 }
 0x89c   :  { %1931 = vadd.xlane.f32.xlu1 %v1930_v13 }
 0x928   :  { %v1935_v12 = vpop.xlane.xlu0 %1934 }
 0x929   :  { %v1937_v14 = vmul.f32 0.03125, %v1935_v12  ;;  %v1932_v15 = vpop.xlane.xlu1 %1931 }
 0x92a   :  { %v1936_v16 = vmul.f32 0.03125, %v1932_v15 }
 0x92b   :  { %v1939_v17 = vsub.f32 %v1927_v8, %v1937_v14 }
 0x92c   :  { %v1938_v18 = vsub.f32 %v1926_v10, %v1936_v16 }
 0x92d   :  { %v1941_v19 = vmul.f32 %v1939_v17, %v1939_v17 }
 0x92e   :  { %v1940_v20 = vmul.f32 %v1938_v18, %v1938_v18 }
 0x92f   :  { %v1945_v21 = vsel %vm60_vm0, %v1941_v19, 0.0 }
 0x930   :  { %1946 = vadd.xlane.f32.xlu0 %v1945_v21  ;;  %v1942_v22 = vsel %vm60_vm0, %v1940_v20, 0.0 }
 0x931   :  { %1943 = vadd.xlane.f32.xlu1 %v1942_v22 }
 0x9bd   :  { %v1947_v23 = vpop.xlane.xlu0 %1946 }
 0x9be   :  { %v1949_v24 = vmul.f32 0.03125, %v1947_v23  ;;  %v1944_v25 = vpop.xlane.xlu1 %1943 }
 0x9bf   :  { %v1948_v7 = vmul.f32 0.03125, %v1944_v25 }
 0x9c0   :  { %v1951_v5 = vadd.f32 1e-06, %v1949_v24 }
 0x9c1   :  { %v1950_v26 = vadd.f32 1e-06, %v1948_v7 }
 0x9c2   :  { %2320 = vrsqrt.f32 %v1951_v5 }
 0x9c3   :  { %2322 = vrsqrt.f32 %v1950_v26 }
 0x9cc   :  { %v2321_v27 = vpop.eup %2320 }
 0x9cd   :  { %v2323_v29 = vpop.eup %2322  ;;  %v1955_v30 = vmul.f32 %v2321_v27, %v1939_v17 }
 0x9ce   :  { %v1954_v31 = vmul.f32 %v2323_v29, %v1938_v18 }
 0x9cf   :  { %v1963_v33 = vmul.f32 %v2032_v28, %v1955_v30 }
 0x9d0   :  { %v1962_v34 = vmul.f32 %v2032_v28, %v1954_v31 }
 0x9d1   :  { %v1971_v35 = vadd.f32 %v2033_v32, %v1963_v33 }
 0x9d2   :  { %v1970_v36 = vadd.f32 %v2033_v32, %v1962_v34 }
 0x9d3   :  { %1973 = vst.msk [vmem:[#allocation5 + $0x8] sm:$0xff] %vm60_vm0, %v1971_v35 }
 0x9d4   :  { %1972 = vst.msk [vmem:[#allocation5] sm:$0xff] %vm60_vm0, %v1970_v36 }
 0x9d5   :  { %2335 = shalt.err (!%p2332_p4)
}
 0x9d6   :  { %s2336_s19 = scalar_lea.hbm %s2789_s13, 256 }
 0x9d7   :  { %p2337_p5 = scmp.ne.s32.totalorder %s2789_s13, %s2336_s19  ;;  %p2340_p6 = scmp.lt.u32.totalorder %s2336_s19, %s2789_s13 }
 0x9d9   :  { %p2342_p7 = pnand %p2340_p6, %p2337_p5 }
 0x9db   :  { %2345 = shalt.err (!%p2342_p7)
}
 0x9dc   :  { %s2365_s22 = smov 128  }
 0x9dd   :  { %1985 = dma.vmem_to_hbm [thread:$0]  %s1980_s17, 256, %s2789_s13, [#allocation6], %s2365_s22, %s2365_s22, %s2361_s23  }
 0x9de   :  { %2346 = dma.done.wait [#allocation6], 256  }
 0x9df   :  { %2347 = vsyncadd [#allocation6], 4294967040 }
 0x9e0   :  { %1993 = vsyncpa [#allocation6], 1 }

</bundles_post_ra>
